<compile_context>
chip_gen: v7x
topology: tpu7x:2x2x1
jax: 0.10.0
libtpu: 0.0.40
codegen_flags: <defaults>
</compile_context>

<pallas_src>
import functools

import jax
import jax.numpy as jnp
from jax import lax
from jax.experimental import pallas as pl
from jax.experimental.pallas import tpu as pltpu


def _triplet_kernel(m1_ref, m2_ref, m3_ref, xc_ref, xt_ref, xi_ref, out_ref):
    # m*_ref: (k, d) weights, x*_ref: (d, n) activations, all in VMEM.
    dot = functools.partial(
        lax.dot_general,
        dimension_numbers=(((1,), (0,)), ((), ())),
        precision=lax.Precision.HIGHEST,          # exact f32 on the MXU
        preferred_element_type=jnp.float32,
    )
    a = dot(m1_ref[...], xc_ref[...])   # (k, n)
    b = dot(m2_ref[...], xt_ref[...])   # (k, n)
    c = dot(m3_ref[...], xi_ref[...])   # (k, n)

    prod = a * b * c                    # (k, n) elementwise on the VPU

    # Stay 2-D until the very end: lane-axis reduce (keepdims) then sublane
    # reduce, then a single scalar write into SMEM.
    row = jnp.sum(prod, axis=-1, keepdims=True)   # (k, 1)
    out_ref[0, 0] = jnp.sum(row)                  # scalar -> SMEM


def triplet_feature(m1, m2, m3, x_c, x_t, x_i):
    """Pallas wrapper.

    Operands are tiny, so everything lives in VMEM with no grid tiling and no
    per-call packing/copies: six small parallel input DMAs straight into the
    kernel.
    """
    k, d = m1.shape
    d2, n = x_c.shape
    assert d == d2 and m2.shape == (k, d) and m3.shape == (k, d)
    assert x_t.shape == (d, n) and x_i.shape == (d, n)

    itemsize = 4  # f32
    flops = 3 * (2 * k * d * n) + 3 * k * n          # 3 matmuls + 2 muls + sum
    bytes_accessed = (3 * k * d + 3 * d * n) * itemsize + itemsize

    out = pl.pallas_call(
        _triplet_kernel,
        out_shape=jax.ShapeDtypeStruct((1, 1), jnp.float32),
        in_specs=[pl.BlockSpec(memory_space=pltpu.MemorySpace.VMEM)] * 6,
        out_specs=pl.BlockSpec(memory_space=pltpu.MemorySpace.SMEM),
        cost_estimate=pl.CostEstimate(
            flops=flops, transcendentals=0, bytes_accessed=bytes_accessed
        ),
    )(m1, m2, m3, x_c, x_t, x_i)
    return out[0, 0]


def triplet_feature_ref(m1, m2, m3, x_c, x_t, x_i):
    return jnp.sum((m1 @ x_c) * (m2 @ x_t) * (m3 @ x_i))


if __name__ == "__main__":
    # Deterministic parameter init (module __init__: torch.randn(k, d)) and inputs.
    k, d, n = 16, 32, 8
    key = jax.random.PRNGKey(0)
    km1, km2, km3, kc, kt, ki = jax.random.split(key, 6)

    m1 = jax.random.normal(km1, (k, d), dtype=jnp.float32)
    m2 = jax.random.normal(km2, (k, d), dtype=jnp.float32)
    m3 = jax.random.normal(km3, (k, d), dtype=jnp.float32)

    x_c = jax.random.normal(kc, (d, n), dtype=jnp.float32)
    x_t = jax.random.normal(kt, (d, n), dtype=jnp.float32)
    x_i = jax.random.normal(ki, (d, n), dtype=jnp.float32)

    out = jax.block_until_ready(triplet_feature(m1, m2, m3, x_c, x_t, x_i))

    ref = triplet_feature_ref(m1, m2, m3, x_c, x_t, x_i)
    assert jnp.allclose(out, ref, rtol=1e-5, atol=1e-4), (out, ref)

    print("KERNEL_OK")
</pallas_src>

<mosaic_0001>
module attributes {stable_mosaic.version = 11 : i64} {
  func.func @_triplet_kernel(%arg0: memref<16x32xf32, #tpu.memory_space<vmem>>, %arg1: memref<16x32xf32, #tpu.memory_space<vmem>>, %arg2: memref<16x32xf32, #tpu.memory_space<vmem>>, %arg3: memref<32x8xf32, #tpu.memory_space<vmem>>, %arg4: memref<32x8xf32, #tpu.memory_space<vmem>>, %arg5: memref<32x8xf32, #tpu.memory_space<vmem>>, %arg6: memref<1x1xf32, #tpu.memory_space<smem>>) attributes {dimension_semantics = [], scalar_prefetch = 0 : i64, scratch_operands = 0 : i64, tpu.core_type = #tpu.core_type<tc>} {
    %c0 = arith.constant 0 : index
    %c0_0 = arith.constant 0 : index
    %0 = vector.load %arg0[%c0, %c0_0] : memref<16x32xf32, #tpu.memory_space<vmem>>, vector<16x32xf32>
    %c0_1 = arith.constant 0 : index
    %c0_2 = arith.constant 0 : index
    %1 = vector.load %arg3[%c0_1, %c0_2] : memref<32x8xf32, #tpu.memory_space<vmem>>, vector<32x8xf32>
    %cst = arith.constant dense<0.000000e+00> : vector<16x8xf32>
    %2 = tpu.matmul %0, %1, %cst {dimension_numbers = #tpu.dot_dimension_numbers<[1], [0], [0], [1], [0, 0, 1, 1], [], []>, precision = #tpu.contract_precision<fp32>} : vector<16x32xf32>, vector<32x8xf32>, vector<16x8xf32> -> vector<16x8xf32>
    %c0_3 = arith.constant 0 : index
    %c0_4 = arith.constant 0 : index
    %3 = vector.load %arg1[%c0_3, %c0_4] : memref<16x32xf32, #tpu.memory_space<vmem>>, vector<16x32xf32>
    %c0_5 = arith.constant 0 : index
    %c0_6 = arith.constant 0 : index
    %4 = vector.load %arg4[%c0_5, %c0_6] : memref<32x8xf32, #tpu.memory_space<vmem>>, vector<32x8xf32>
    %cst_7 = arith.constant dense<0.000000e+00> : vector<16x8xf32>
    %5 = tpu.matmul %3, %4, %cst_7 {dimension_numbers = #tpu.dot_dimension_numbers<[1], [0], [0], [1], [0, 0, 1, 1], [], []>, precision = #tpu.contract_precision<fp32>} : vector<16x32xf32>, vector<32x8xf32>, vector<16x8xf32> -> vector<16x8xf32>
    %c0_8 = arith.constant 0 : index
    %c0_9 = arith.constant 0 : index
    %6 = vector.load %arg2[%c0_8, %c0_9] : memref<16x32xf32, #tpu.memory_space<vmem>>, vector<16x32xf32>
    %c0_10 = arith.constant 0 : index
    %c0_11 = arith.constant 0 : index
    %7 = vector.load %arg5[%c0_10, %c0_11] : memref<32x8xf32, #tpu.memory_space<vmem>>, vector<32x8xf32>
    %cst_12 = arith.constant dense<0.000000e+00> : vector<16x8xf32>
    %8 = tpu.matmul %6, %7, %cst_12 {dimension_numbers = #tpu.dot_dimension_numbers<[1], [0], [0], [1], [0, 0, 1, 1], [], []>, precision = #tpu.contract_precision<fp32>} : vector<16x32xf32>, vector<32x8xf32>, vector<16x8xf32> -> vector<16x8xf32>
    %9 = arith.mulf %2, %5 : vector<16x8xf32>
    %10 = arith.mulf %9, %8 : vector<16x8xf32>
    %cst_13 = arith.constant dense<0.000000e+00> : vector<16xf32>
    %11 = vector.multi_reduction <add>, %10, %cst_13 [1] : vector<16x8xf32> to vector<16xf32>
    %12 = vector.shape_cast %11 : vector<16xf32> to vector<16x1xf32>
    %13 = vector.shape_cast %12 : vector<16x1xf32> to vector<1x16x1xf32>
    %cst_14 = arith.constant dense<0.000000e+00> : vector<1xf32>
    %14 = vector.multi_reduction <add>, %13, %cst_14 [1, 2] : vector<1x16x1xf32> to vector<1xf32>
    %15 = vector.shape_cast %14 : vector<1xf32> to vector<1x1x1xf32>
    %16 = vector.extract %15[0, 0, 0] : f32 from vector<1x1x1xf32>
    %c0_15 = arith.constant 0 : index
    %c0_16 = arith.constant 0 : index
    %17 = memref.load %arg6[%c0_15, %c0_16] : memref<1x1xf32, #tpu.memory_space<smem>>
    memref.store %16, %arg6[%c0_15, %c0_16] : memref<1x1xf32, #tpu.memory_space<smem>>
    return
  }
}

</mosaic_0001>

<bundles_post_ra>
// kernel: tpu_custom_call.1
= control target key start
LH: loop header
LB: loop body
LE: loop exit
PB: predicated region body
PF: predicated region fallthrough
CT: control target
= control target key end

     0   :  { %vm30_vm0 = vcmask 261120   ;;  %s2527_s0 = inlined_call_operand.vmem [shape: f32[16,32], index: 0, kind: input, shape index: {}]   ;;  %s2528_s1 = inlined_call_operand.vmem [shape: f32[16,32], index: 1, kind: input, shape index: {}]   ;;  %s2529_s2 = inlined_call_operand.vmem [shape: f32[16,32], index: 2, kind: input, shape index: {}]   ;;  %s2530_s3 = inlined_call_operand.vmem [shape: f32[32,8], index: 3, kind: input, shape index: {}]   ;;  %s2531_s4 = inlined_call_operand.vmem [shape: f32[32,8], index: 4, kind: input, shape index: {}]   ;;  %s2532_s5 = inlined_call_operand.vmem [shape: f32[32,8], index: 5, kind: input, shape index: {}]   ;;  %s2533_s6 = inlined_call_operand.hbm [shape: f32[1,1], index: 6, kind: output, shape index: {}]  }
   0x1   :  { %v26_v0 = vld [vmem:[%s2530_s3] sm:$0xff]  ;;  %v27_v1 = vld [vmem:[%s2530_s3 + $0x8] sm:$0xff]  ;;  %v28_v2 = vld [vmem:[%s2530_s3 + $0x10] sm:$0xff] }
   0x2   :  { %v38_v3 = vand.u32 4294901760, %v26_v0  ;;  %v41_v4 = vand.u32 4294901760, %v27_v1  ;;  %v29_v5 = vld [vmem:[%s2530_s3 + $0x18] sm:$0xff]  ;;  %v44_v6 = vand.u32 4294901760, %v28_v2  ;;  %v24_v7 = vld [vmem:[%s2527_s0] sm:$0xff]  ;;  %v25_v8 = vld [vmem:[%s2527_s0 + $0x8] sm:$0xff] }
   0x3   :  { %v47_v9 = vand.u32 4294901760, %v29_v5  ;;  %v32_v10 = vsel %vm30_vm0, %v24_v7, 0  ;;  %v35_v11 = vsel %vm30_vm0, %v25_v8, 0 }
   0x4   :  { %v2235_v12 = vpack.c.bf16 %v41_v4, %v38_v3  ;;  %v2237_v13 = vand.u32 4294901760, %v32_v10  ;;  %v2239_v14 = vand.u32 4294901760, %v35_v11  ;;  %v128_v15 = vsub.f32 %v26_v0, %v38_v3 }
   0x5   :  { %v2241_v16 = vpack.c.bf16 %v47_v9, %v44_v6  ;;  %v135_v17 = vsub.f32 %v27_v1, %v41_v4  ;;  %v2243_v18 = vsub.f32 %v28_v2, %v44_v6  ;;  %v2245_v19 = vsub.f32 %v29_v5, %v47_v9 }
   0x6   :  { %1991 = vmatprep.subr.bf16.mxu1 %v2235_v12  ;;  %2015 = vmatprep.subr.bf16.mxu0 %v2235_v12  ;;  %v2250_v20 = vsub.f32 %v32_v10, %v2237_v13  ;;  %v2253_v21 = vsub.f32 %v35_v11, %v2239_v14  ;;  %v129_v22 = vand.u32 4294901760, %v128_v15 }
   0x7   :  { %1993 = vmatpush3.bf16.msra.mxu1 %v2235_v12  ;;  %2017 = vmatpush3.bf16.msra.mxu0 %v2235_v12  ;;  %v136_v23 = vand.u32 4294901760, %v135_v17  ;;  %v143_v24 = vand.u32 4294901760, %v2243_v18  ;;  %v150_v25 = vand.u32 4294901760, %v2245_v19 }
   0x8   :  { %11 = vsyncpa [#allocation3], 0  ;;  %1995 = vmatprep.subr.bf16.mxu1 %v2241_v16  ;;  %2019 = vmatprep.subr.bf16.mxu0 %v2241_v16  ;;  %v108_v26 = vand.u32 4294901760, %v2250_v20  ;;  %v118_v27 = vand.u32 4294901760, %v2253_v21  ;;  %v130_v28 = vsub.f32 %v128_v15, %v129_v22  ;;  %v2266_v29 = vld [vmem:[%s2531_s4] sm:$0xff]  ;;  %v2275_v37 = vld [vmem:[%s2531_s4 + $0x8] sm:$0xff]  ;;  %v2006_v60 = vpack.c.bf16 %v135_v17, %v128_v15 }
   0x9   :  { %v137_v30 = vsub.f32 %v135_v17, %v136_v23  ;;  %v2022_v31 = vpack.c.bf16 %v136_v23, %v129_v22  ;;  %v144_v32 = vsub.f32 %v2243_v18, %v143_v24  ;;  %v151_v33 = vsub.f32 %v2245_v19, %v150_v25  ;;  %v2283_v42 = vld [vmem:[%s2532_s5] sm:$0xff]  ;;  %v2288_v43 = vld [vmem:[%s2532_s5 + $0x8] sm:$0xff]  ;;  %v2316_v61 = vld [vmem:[%s2531_s4 + $0x10] sm:$0xff]  ;;  %s2167_s30 = scalar_lea.hbm %s2533_s6, 16 }
   0xa   :  { %v109_v34 = vsub.f32 %v2250_v20, %v108_v26  ;;  %1833 = vmatprep.mubr.f32.mxu0 %v108_v26  ;;  %v119_v35 = vsub.f32 %v2253_v21, %v118_v27  ;;  %v131_v36 = vand.u32 4294901760, %v130_v28  ;;  %v578_v41 = vand.u32 4294901760, %v2266_v29  ;;  %v565_v46 = vld [vmem:[%s2528_s1] sm:$0xff]  ;;  %v566_v48 = vld [vmem:[%s2528_s1 + $0x8] sm:$0xff]  ;;  %v2325_v0 = vld [vmem:[%s2531_s4 + $0x18] sm:$0xff]  ;;  %p2168_p0 = scmp.ne.s32.totalorder %s2533_s6, %s2167_s30  ;;  %p2171_p1 = scmp.lt.u32.totalorder %s2167_s30, %s2533_s6 }
   0xb   :  { %1997 = vmatpush3.bf16.msra.mxu1 %v2241_v16  ;;  %2021 = vmatpush3.bf16.msra.mxu0 %v2241_v16  ;;  %v138_v38 = vand.u32 4294901760, %v137_v30  ;;  %v145_v39 = vand.u32 4294901760, %v144_v32  ;;  %v152_v40 = vand.u32 4294901760, %v151_v33  ;;  %v1105_v47 = vld [vmem:[%s2529_s2] sm:$0xff]  ;;  %v2026_v51 = vpack.c.bf16 %v150_v25, %v143_v24  ;;  %v1106_v55 = vld [vmem:[%s2529_s2 + $0x8] sm:$0xff]  ;;  %v1109_v5 = vld [vmem:[%s2532_s5 + $0x10] sm:$0xff] }
   0xc   :  { %v110_v44 = vand.u32 4294901760, %v109_v34  ;;  %v120_v45 = vand.u32 4294901760, %v119_v35  ;;  %2023 = vmatprep.subr.bf16.mxu0 %v2022_v31  ;;  %v581_v52 = vand.u32 4294901760, %v2275_v37  ;;  %v1118_v53 = vand.u32 4294901760, %v2283_v42  ;;  %v1110_v11 = vld [vmem:[%s2532_s5 + $0x18] sm:$0xff]  ;;  %p2173_p2 = pnand %p2171_p1, %p2168_p0 }
   0xd   :  { %v1998_v49 = vpack.c.bf16 %v138_v38, %v131_v36  ;;  %v2002_v50 = vpack.c.bf16 %v152_v40, %v145_v39  ;;  %v1121_v54 = vand.u32 4294901760, %v2288_v43  ;;  %v572_v56 = vsel %vm30_vm0, %v565_v46, 0 }
   0xe   :  { %1800 = vmatprep.mubr.f32.mxu1 %v110_v44  ;;  %1834 = vmatmul.mubr.f32.vlgmr.msra.gmra.mrb[0].mxu0 %v118_v27  ;;  %v1112_v57 = vsel %vm30_vm0, %v1105_v47, 0  ;;  %v575_v58 = vsel %vm30_vm0, %v566_v48, 0  ;;  %v2311_v59 = vsub.f32 %v2266_v29, %v578_v41  ;;  %v2318_v62 = vand.u32 4294901760, %v572_v56 }
   0xf   :  { %1801 = vmatmul.mubr.f32.vlgmr.msra.gmra.mrb[0].mxu1 %v120_v45  ;;  %1999 = vmatprep.subr.bf16.mxu1 %v1998_v49  ;;  %v2320_v63 = vand.u32 4294901760, %v1112_v57  ;;  %v2327_v1 = vand.u32 4294901760, %v575_v58  ;;  %v2331_v3 = vsub.f32 %v2275_v37, %v581_v52  ;;  %v1115_v4 = vsel %vm30_vm0, %v1106_v55, 0 }
  0x10   :  { %2001 = vmatpush3.bf16.msra.mxu1 %v1998_v49  ;;  %2025 = vmatpush3.bf16.msra.mxu0 %v2022_v31  ;;  %v669_v2 = vand.u32 4294901760, %v2311_v59  ;;  %v2340_v6 = vsub.f32 %v572_v56, %v2318_v62  ;;  %v2345_v8 = vand.u32 4294901760, %v1115_v4  ;;  %v2348_v9 = vsub.f32 %v2283_v42, %v1118_v53 }
  0x11   :  { %2003 = vmatprep.subr.bf16.mxu1 %v2002_v50  ;;  %2027 = vmatprep.subr.bf16.mxu0 %v2026_v51  ;;  %v2343_v7 = vsub.f32 %v1112_v57, %v2320_v63  ;;  %v584_v10 = vand.u32 4294901760, %v2316_v61  ;;  %v676_v15 = vand.u32 4294901760, %v2331_v3  ;;  %v2356_v17 = vsub.f32 %v2288_v43, %v1121_v54 }
  0x12   :  { %1811 = vmatprep.mubr.f32.mxu1 %v2237_v13  ;;  %1844 = vmatprep.mubr.f32.mxu0 %v2237_v13  ;;  %v2010_v22 = vpack.c.bf16 %v2245_v19, %v2243_v18  ;;  %v587_v23 = vand.u32 4294901760, %v2325_v0  ;;  %v1209_v24 = vand.u32 4294901760, %v2348_v9  ;;  %v1124_v25 = vand.u32 4294901760, %v1109_v5 }
  0x13   :  { %v648_v26 = vand.u32 4294901760, %v2340_v6  ;;  %v1188_v27 = vand.u32 4294901760, %v2343_v7  ;;  %v1216_v28 = vand.u32 4294901760, %v2356_v17  ;;  %v1127_v30 = vand.u32 4294901760, %v1110_v11 }
  0x14   :  { %2005 = vmatpush3.bf16.msra.mxu1 %v2002_v50  ;;  %2029 = vmatpush3.bf16.msra.mxu0 %v2026_v51  ;;  %v2367_v31 = vsub.f32 %v575_v58, %v2327_v1  ;;  %v670_v18 = vsub.f32 %v2311_v59, %v669_v2  ;;  %v2373_v19 = vsub.f32 %v1115_v4, %v2345_v8  ;;  %vm1649_vm1 = vcmask 64512  }
  0x15   :  { %2007 = vmatprep.subr.bf16.mxu1 %v2006_v60  ;;  %2031 = vmatprep.subr.bf16.mxu0 %v2235_v12  ;;  %v677_v32 = vsub.f32 %v2331_v3, %v676_v15  ;;  %v1210_v33 = vsub.f32 %v2348_v9, %v1209_v24  ;;  %v2384_v34 = vsub.f32 %v2316_v61, %v584_v10  ;;  %vm1656_vm2 = vcmask 7168  }
  0x16   :  { %v2389_v35 = vpack.c.bf16 %v581_v52, %v578_v41  ;;  %v1217_v36 = vsub.f32 %v2356_v17, %v1216_v28  ;;  %v2395_v37 = vpack.c.bf16 %v1121_v54, %v1118_v53  ;;  %v649_v38 = vsub.f32 %v2340_v6, %v648_v26 }
  0x17   :  { %1812 = vmatmul.mubr.f32.vlgmr.msra.gmra.mrb[0].mxu1 %v2239_v14  ;;  %1845 = vmatmul.mubr.f32.vlgmr.msra.gmra.mrb[0].mxu0 %v2239_v14  ;;  %v683_v29 = vand.u32 4294901760, %v2384_v34  ;;  %v658_v39 = vand.u32 4294901760, %v2367_v31  ;;  %v2408_v40 = vsub.f32 %v2325_v0, %v587_v23  ;;  %v2410_v41 = vsub.f32 %v1109_v5, %v1124_v25 }
  0x18   :  { %2009 = vmatpush3.bf16.msra.mxu1 %v2006_v60  ;;  %2033 = vmatpush3.bf16.msra.mxu0 %v2235_v12  ;;  %v1189_v12 = vsub.f32 %v2343_v7, %v1188_v27  ;;  %v2412_v42 = vsub.f32 %v1110_v11, %v1127_v30  ;;  %v671_v43 = vand.u32 4294901760, %v670_v18  ;;  %v678_v44 = vand.u32 4294901760, %v677_v32 }
  0x19   :  { %2011 = vmatprep.subr.bf16.mxu1 %v2010_v22  ;;  %2035 = vmatprep.subr.bf16.mxu0 %v2241_v16  ;;  %v1198_v45 = vand.u32 4294901760, %v2373_v19  ;;  %v1211_v46 = vand.u32 4294901760, %v1210_v33  ;;  %v1223_v47 = vand.u32 4294901760, %v2410_v41  ;;  %v2421_v49 = vpack.c.bf16 %v587_v23, %v584_v10 }
  0x1a   :  { %1822 = vmatprep.mubr.f32.mxu1 %v2250_v20  ;;  %1855 = vmatprep.mubr.f32.mxu0 %v2237_v13  ;;  %v1218_v20 = vand.u32 4294901760, %v1217_v36  ;;  %v690_v13 = vand.u32 4294901760, %v2408_v40  ;;  %v1230_v48 = vand.u32 4294901760, %v2412_v42  ;;  %v2423_v50 = vpack.c.bf16 %v1127_v30, %v1124_v25 }
  0x1b   :  { %v650_v51 = vand.u32 4294901760, %v649_v38  ;;  %v1190_v52 = vand.u32 4294901760, %v1189_v12  ;;  %v1224_v54 = vsub.f32 %v2410_v41, %v1223_v47  ;;  %v659_v56 = vsub.f32 %v2367_v31, %v658_v39 }
  0x1c   :  { %2013 = vmatpush3.bf16.msra.mxu1 %v2010_v22  ;;  %2037 = vmatpush3.bf16.msra.mxu0 %v2241_v16  ;;  %v684_v16 = vsub.f32 %v2384_v34, %v683_v29  ;;  %v691_v53 = vsub.f32 %v2408_v40, %v690_v13  ;;  %v1231_v55 = vsub.f32 %v2412_v42, %v1230_v48 }
  0x1d   :  { %2039 = vmatprep.subr.bf16.mxu1 %v2389_v35  ;;  %2087 = vmatprep.subr.bf16.mxu0 %v2395_v37  ;;  %v1199_v57 = vsub.f32 %v2373_v19, %v1198_v45  ;;  %v2046_v58 = vpack.c.bf16 %v678_v44, %v671_v43  ;;  %v2094_v60 = vpack.c.bf16 %v1218_v20, %v1211_v46  ;;  %v1225_v61 = vand.u32 4294901760, %v1224_v54 }
  0x1e   :  { %v1232_v0 = vand.u32 4294901760, %v1231_v55  ;;  %v660_v4 = vand.u32 4294901760, %v659_v56  ;;  %v2054_v22 = vpack.c.bf16 %v2331_v3, %v2311_v59  ;;  %v2102_v23 = vpack.c.bf16 %v2356_v17, %v2348_v9 }
  0x1f   :  { %1823 = vmatmul.mubr.f32.vlgmr.msra.gmra.mrb[0].mxu1 %v2253_v21  ;;  %1856 = vmatmul.mubr.f32.vlgmr.msra.gmra.mrb[0].mxu0 %v2239_v14  ;;  %v685_v21 = vand.u32 4294901760, %v684_v16  ;;  %v692_v14 = vand.u32 4294901760, %v691_v53  ;;  %v1200_v5 = vand.u32 4294901760, %v1199_v57  ;;  %v2058_v25 = vpack.c.bf16 %v2408_v40, %v2384_v34 }
  0x20   :  { %2041 = vmatpush3.bf16.msra.mxu1 %v2389_v35  ;;  %2089 = vmatpush3.bf16.msra.mxu0 %v2395_v37  ;;  %v2098_v11 = vpack.c.bf16 %v1232_v0, %v1225_v61  ;;  %v2106_v30 = vpack.c.bf16 %v2412_v42, %v2410_v41  ;;  %v2070_v18 = vpack.c.bf16 %v676_v15, %v669_v2 }
  0x21   :  { %2043 = vmatprep.subr.bf16.mxu1 %v2421_v49  ;;  %2091 = vmatprep.subr.bf16.mxu0 %v2423_v50  ;;  %v2050_v10 = vpack.c.bf16 %v692_v14, %v685_v21  ;;  %v2118_v32 = vpack.c.bf16 %v1216_v28, %v1209_v24  ;;  %v2074_v59 = vpack.c.bf16 %v690_v13, %v683_v29 }
  0x22   :  { %1866 = vmatprep.mubr.f32.mxu1 %v650_v51  ;;  %1932 = vmatprep.mubr.f32.mxu0 %v1190_v52  ;;  %v2122_v2 = vpack.c.bf16 %v1230_v48, %v1223_v47 }
  0x24   :  { %2045 = vmatpush3.bf16.msra.mxu1 %v2421_v49  ;;  %2093 = vmatpush3.bf16.msra.mxu0 %v2423_v50 }
  0x25   :  { %2047 = vmatprep.subr.bf16.mxu1 %v2046_v58  ;;  %2095 = vmatprep.subr.bf16.mxu0 %v2094_v60 }
  0x27   :  { %1867 = vmatmul.mubr.f32.vlgmr.msra.gmra.mrb[2].mxu1 %v660_v4  ;;  %1933 = vmatmul.mubr.f32.vlgmr.msra.gmra.mrb[2].mxu0 %v1200_v5 }
  0x28   :  { %2049 = vmatpush3.bf16.msra.mxu1 %v2046_v58  ;;  %2097 = vmatpush3.bf16.msra.mxu0 %v2094_v60 }
  0x29   :  { %2051 = vmatprep.subr.bf16.mxu1 %v2050_v10  ;;  %2099 = vmatprep.subr.bf16.mxu0 %v2098_v11 }
  0x2a   :  { %1877 = vmatprep.mubr.f32.mxu1 %v2318_v62  ;;  %1943 = vmatprep.mubr.f32.mxu0 %v2320_v63 }
  0x2c   :  { %2053 = vmatpush3.bf16.msra.mxu1 %v2050_v10  ;;  %2101 = vmatpush3.bf16.msra.mxu0 %v2098_v11 }
  0x2d   :  { %2055 = vmatprep.subr.bf16.mxu1 %v2054_v22  ;;  %2103 = vmatprep.subr.bf16.mxu0 %v2102_v23 }
  0x2f   :  { %1878 = vmatmul.mubr.f32.vlgmr.msra.gmra.mrb[2].mxu1 %v2327_v1  ;;  %1944 = vmatmul.mubr.f32.vlgmr.msra.gmra.mrb[2].mxu0 %v2345_v8 }
  0x30   :  { %2057 = vmatpush3.bf16.msra.mxu1 %v2054_v22  ;;  %2105 = vmatpush3.bf16.msra.mxu0 %v2102_v23 }
  0x31   :  { %2059 = vmatprep.subr.bf16.mxu1 %v2058_v25  ;;  %2107 = vmatprep.subr.bf16.mxu0 %v2106_v30 }
  0x32   :  { %1888 = vmatprep.mubr.f32.mxu1 %v2340_v6  ;;  %1954 = vmatprep.mubr.f32.mxu0 %v2343_v7 }
  0x34   :  { %2061 = vmatpush3.bf16.msra.mxu1 %v2058_v25  ;;  %2109 = vmatpush3.bf16.msra.mxu0 %v2106_v30 }
  0x35   :  { %2063 = vmatprep.subr.bf16.mxu1 %v2389_v35  ;;  %2111 = vmatprep.subr.bf16.mxu0 %v2395_v37 }
  0x37   :  { %1889 = vmatmul.mubr.f32.vlgmr.msra.gmra.mrb[2].mxu1 %v2367_v31  ;;  %1955 = vmatmul.mubr.f32.vlgmr.msra.gmra.mrb[2].mxu0 %v2373_v19 }
  0x38   :  { %2065 = vmatpush3.bf16.msra.mxu1 %v2389_v35  ;;  %2113 = vmatpush3.bf16.msra.mxu0 %v2395_v37 }
  0x39   :  { %2067 = vmatprep.subr.bf16.mxu1 %v2421_v49  ;;  %2115 = vmatprep.subr.bf16.mxu0 %v2423_v50 }
  0x3a   :  { %1899 = vmatprep.mubr.f32.mxu1 %v648_v26  ;;  %1965 = vmatprep.mubr.f32.mxu0 %v1188_v27 }
  0x3c   :  { %2069 = vmatpush3.bf16.msra.mxu1 %v2421_v49  ;;  %2117 = vmatpush3.bf16.msra.mxu0 %v2423_v50 }
  0x3d   :  { %2071 = vmatprep.subr.bf16.mxu1 %v2070_v18  ;;  %2119 = vmatprep.subr.bf16.mxu0 %v2118_v32 }
  0x3f   :  { %1900 = vmatmul.mubr.f32.vlgmr.msra.gmra.mrb[2].mxu1 %v658_v39  ;;  %1966 = vmatmul.mubr.f32.vlgmr.msra.gmra.mrb[2].mxu0 %v1198_v45 }
  0x40   :  { %2073 = vmatpush3.bf16.msra.mxu1 %v2070_v18  ;;  %2121 = vmatpush3.bf16.msra.mxu0 %v2118_v32 }
  0x41   :  { %2075 = vmatprep.subr.bf16.mxu1 %v2074_v59  ;;  %2123 = vmatprep.subr.bf16.mxu0 %v2122_v2 }
  0x42   :  { %1910 = vmatprep.mubr.f32.mxu1 %v2318_v62  ;;  %1976 = vmatprep.mubr.f32.mxu0 %v2320_v63 }
  0x44   :  { %2077 = vmatpush3.bf16.msra.mxu1 %v2074_v59  ;;  %2125 = vmatpush3.bf16.msra.mxu0 %v2122_v2 }
  0x45   :  { %2079 = vmatprep.subr.bf16.mxu1 %v2389_v35  ;;  %2127 = vmatprep.subr.bf16.mxu0 %v2395_v37 }
  0x47   :  { %1911 = vmatmul.mubr.f32.vlgmr.msra.gmra.mrb[2].mxu1 %v2327_v1  ;;  %1977 = vmatmul.mubr.f32.vlgmr.msra.gmra.mrb[2].mxu0 %v2345_v8 }
  0x48   :  { %2081 = vmatpush3.bf16.msra.mxu1 %v2389_v35  ;;  %2129 = vmatpush3.bf16.msra.mxu0 %v2395_v37 }
  0x49   :  { %2083 = vmatprep.subr.bf16.mxu1 %v2421_v49  ;;  %2131 = vmatprep.subr.bf16.mxu0 %v2423_v50 }
  0x4a   :  { %1921 = vmatprep.mubr.f32.mxu1 %v2318_v62  ;;  %1987 = vmatprep.mubr.f32.mxu0 %v2320_v63 }
  0x4c   :  { %2085 = vmatpush3.bf16.msra.mxu1 %v2421_v49  ;;  %2133 = vmatpush3.bf16.msra.mxu0 %v2423_v50 }
  0x4f   :  { %1922 = vmatmul.mubr.f32.vlgmr.msra.gmra.mrb[2].mxu1 %v2327_v1  ;;  %1988 = vmatmul.mubr.f32.vlgmr.msra.gmra.mrb[2].mxu0 %v2345_v8 }
  0xf2   :  { %v1824_v3 = vpop.f32.mrb[0].mxu1  ;;  %v1857_v6 = vpop.f32.mrb[0].mxu0 }
  0xf3   :  { %v2134_v7 = vadd.f32 %v1857_v6, %v1824_v3  ;;  %v299_v9 = vpop.f32.mrb[1].mxu1  ;;  %v555_v15 = vpop.f32.mrb[1].mxu0 }
  0xf4   :  { %v2135_v17 = vadd.f32 %v555_v15, %v299_v9 }
 0x122   :  { %v1923_v24 = vpop.f32.mrb[2].mxu1  ;;  %v1989_v26 = vpop.f32.mrb[2].mxu0 }
 0x123   :  { %v1646_v27 = vmul.f32 %v2134_v7, %v1923_v24  ;;  %v1095_v62 = vpop.f32.mrb[3].mxu1  ;;  %v1635_v28 = vpop.f32.mrb[3].mxu0 }
 0x124   :  { %v1645_v63 = vmul.f32 %v2135_v17, %v1095_v62 }
 0x125   :  { %v1648_v31 = vmul.f32 %v1989_v26, %v1646_v27 }
 0x126   :  { %v1647_v19 = vmul.f32 %v1645_v63, %v1635_v28 }
 0x127   :  { %v1653_v1 = vsel %vm1649_vm1, %v1648_v31, 0.0 }
 0x128   :  { %v1650_v33 = vsel %vm1649_vm1, %v1647_v19, 0.0 }
 0x129   :  { %1651 = vadd.xlane.f32.xlu0 %v1650_v33 }
 0x12d   :  { %1654 = vadd.xlane.f32.xlu0 %v1653_v1 }
 0x1b6   :  { %v1652_v8 = vpop.xlane.xlu0 %1651 }
 0x1b7   :  { %v1657_v35 = vsel %vm1656_vm2, %v1652_v8, 0.0 }
 0x1ba   :  { %v1655_v34 = vpop.xlane.xlu0 %1654 }
 0x1bb   :  { %v1658_v36 = vsel %vm1656_vm2, %v1655_v34, 0.0 }
 0x1bc   :  { %v1659_v37 = vadd.f32 %v1658_v36, %v1657_v35 }
 0x1be   :  { %1660 = vadd.xlane.f32.xlu1 %v1659_v37 }
 0x24b   :  { %v1661_v38 = vpop.xlane.xlu1 %1660 }
 0x24c   :  { %v1662_v12 = vrot.slane %v1661_v38, 4 }
 0x24e   :  { %v1663_v29 = vadd.f32 %v1662_v12, %v1661_v38 }
 0x250   :  { %v1664_v39 = vrot.slane %v1663_v29, 2 }
 0x252   :  { %v1665_v40 = vadd.f32 %v1664_v39, %v1663_v29 }
 0x254   :  { %v1666_v41 = vrot.slane %v1665_v40, 1 }
 0x256   :  { %v1667_v42 = vadd.f32 %v1666_v41, %v1665_v40 }
 0x258   :  { %2164 = vpush %v1667_v42 }
 0x289   :  { %s2165_s5 = spop %2164 }
 0x28a   :  { %1670 = sst [smem:[#allocation2]] %s2165_s5 }
 0x28b   :  { %2176 = shalt.err (!%p2173_p2)
}
 0x28c   :  { %s2179_s9 = smov [#allocation2]  }
 0x28d   :  { %1678 = dma.smem_to_hbm %s2179_s9, 16, %s2533_s6, [#allocation3]  }
 0x28e   :  { %2177 = dma.done.wait [#allocation3], 16  }
 0x28f   :  { %2178 = vsyncadd [#allocation3], 4294967280 }
 0x290   :  { %1682 = sfence }
 0x291   :  { %1683 = vsyncpa [#allocation3], 1 }

</bundles_post_ra>
